<compile_context>
chip_gen: v5e
topology: v5e:2x2
jax: 0.10.0
libtpu: 0.0.40
codegen_flags: <defaults>
</compile_context>

<pallas_src>
from functools import partial
import math

import jax
import jax.numpy as jnp
from jax import lax
from jax.experimental import pallas as pl
from jax.experimental.pallas import tpu as pltpu

TEMPERATURE = 0.05
EPS = 1e-8            # torch.cosine_similarity eps
_LOG2 = math.log(2.0)

# Contract the LAST dim of both operands (natural (sublane=rows, lane=D)
# layout for both) -> no XLU transpose feeding the MXU.
_DN = (((1,), (1,)), ((), ()))


def _softplus_neg(d):
    # numerically stable softplus(-d) == -log(sigmoid(d))
    return jnp.maximum(-d, 0.0) + jnp.log1p(jnp.exp(-jnp.abs(d)))


def _round_up(a, m):
    return (a + m - 1) // m * m


def _cdiv(a, b):
    return -(-a // b)


def _vmem_capacity_bytes():
    try:
        info = pltpu.get_tpu_info()
        for attr in ("vmem_capacity_bytes", "vmem_bytes", "vmem_size_bytes"):
            v = getattr(info, attr, None)
            if isinstance(v, int) and v > 0:
                return v
    except Exception:
        pass
    return 64 * 1024 * 1024  # conservative: v7x per-TensorCore VMEM


def fused_loss_kernel(
    x_ref, p_ref, n_ref, out_ref,
    acc_xn, acc_xp, acc_xx, acc_pp, acc_nn_row,
    *swap_scratch,
    add_swap_loss, inv_temperature, tb, batch,
):
    i = pl.program_id(0)              # row block  ('parallel')
    k = pl.program_id(1)              # D reduction ('arbitrary', innermost)
    last_k = pl.num_programs(1) - 1

    if add_swap_loss:
        acc_px, acc_xx_row = swap_scratch
        x_full = x_ref[...]                              # (B, tk) native dtype
        if tb == batch:
            x = x_full                                   # single row block
        else:
            row0 = pl.multiple_of(i * tb, tb)
            x = x_ref[pl.ds(row0, tb), :]                # (tb, tk) row block
    else:
        x = x_ref[...]                                   # (tb, tk)

    p = p_ref[...]                                       # (tb, tk)
    n = n_ref[...]                                       # (B, tk)

    # MXU: native-dtype operands (bf16 stays bf16), f32 accumulation.
    xn = lax.dot_general(x, n, _DN, preferred_element_type=jnp.float32)   # (tb,B)

    # VPU: rowwise / norm math in f32.
    xf = x.astype(jnp.float32)
    pf = p.astype(jnp.float32)
    nf = n.astype(jnp.float32)

    xp = jnp.sum(xf * pf, axis=-1, keepdims=True)        # (tb,1)
    xx = jnp.sum(xf * xf, axis=-1, keepdims=True)        # (tb,1)
    pp = jnp.sum(pf * pf, axis=-1, keepdims=True)        # (tb,1)

    # Column-layout |n|^2 via a ones-row matmul -> (1,B); no sublane->lane permute.
    ones_row = jnp.ones((1, n.shape[1]), jnp.float32)
    nn_row = lax.dot_general(ones_row, nf * nf, _DN,
                             preferred_element_type=jnp.float32)          # (1,B)

    if add_swap_loss:
        px = lax.dot_general(p, x_full, _DN,
                             preferred_element_type=jnp.float32)          # (tb,B)
        xf_full = x_full.astype(jnp.float32)
        xx_row = lax.dot_general(ones_row, xf_full * xf_full, _DN,
                                 preferred_element_type=jnp.float32)      # (1,B)

    # First reduction step assigns (no (tb,B) zero-fill + reload); later steps
    # accumulate.
    @pl.when(k == 0)
    def _assign():
        acc_xn[...] = xn
        acc_xp[...] = xp
        acc_xx[...] = xx
        acc_pp[...] = pp
        acc_nn_row[...] = nn_row
        if add_swap_loss:
            acc_px[...] = px
            acc_xx_row[...] = xx_row

    @pl.when(k > 0)
    def _accumulate():
        acc_xn[...] += xn
        acc_xp[...] += xp
        acc_xx[...] += xx
        acc_pp[...] += pp
        acc_nn_row[...] += nn_row
        if add_swap_loss:
            acc_px[...] += px
            acc_xx_row[...] += xx_row

    @pl.when(k == last_k)
    def _finalize():
        inv_t = jnp.float32(inv_temperature)
        eps2 = jnp.float32(EPS * EPS)

        # rsqrt(max(sumsq, eps^2)) == 1 / max(||v||, eps)   (torch eps clamp)
        inv_x = lax.rsqrt(jnp.maximum(acc_xx[...], eps2))            # (tb,1)
        inv_p = lax.rsqrt(jnp.maximum(acc_pp[...], eps2))            # (tb,1)
        inv_n_row = lax.rsqrt(jnp.maximum(acc_nn_row[...], eps2))    # (1,B)

        inv_x_t = inv_x * inv_t       # fold 1/temperature into the (tb,1) vector
        sim_pos = acc_xp[...] * (inv_x_t * inv_p)                    # (tb,1)
        sim_neg = acc_xn[...] * (inv_x_t * inv_n_row)                # (tb,B)
        block_loss = jnp.sum(_softplus_neg(sim_pos - sim_neg))

        if add_swap_loss:
            inv_x_row = lax.rsqrt(jnp.maximum(acc_xx_row[...], eps2))  # (1,B)
            sim_swap = acc_px[...] * ((inv_p * inv_t) * inv_x_row)     # (tb,B)
            # diag(sim_swap) == sim_pos (same cosine, different summation
            # order); instead of an iota diag mask, sum the full block and
            # apply the analytic diagonal correction softplus(0) == log(2).
            block_loss += (jnp.sum(_softplus_neg(sim_pos - sim_swap))
                           - jnp.float32(tb * _LOG2))

        val = block_loss * jnp.float32(1.0 / (batch * batch))
        out_ref[...] = jnp.broadcast_to(val, out_ref.shape)


def triplet_in_batch_neg_sigmoid_contrast_loss(
    text_embeddings,
    text_embeddings_pos,
    text_embeddings_neg,
    add_swap_loss=False,
    *,
    temperature=TEMPERATURE,
    block_b=None,
    block_d=None,
):
    x, p, n = text_embeddings, text_embeddings_pos, text_embeddings_neg
    B, D = x.shape
    itemsize = jnp.dtype(x.dtype).itemsize
    n_big = 2 if add_swap_loss else 1
    Bp = max(_round_up(B, 128), 128)   # lane-padded width of the (.,B) scratch

    # ---- per-generation VMEM budget (v7x: 64 MiB/TC, v5e/v6e: 128 MiB) ----
    vmem_cap = _vmem_capacity_bytes()
    budget = min(vmem_cap * 3 // 4, 100 * 1024 * 1024)

    # ---- row-block size tb: big accumulators (and their dot-result temps)
    # are n_big * tb * B f32 each; keep them within ~60% of the budget, but
    # keep tb large so re-streaming n (and x for the swap term) once per row
    # block stays MXU-bound rather than HBM-bound.
    def _acc_bytes(t):
        return 2 * n_big * t * Bp * 4

    if block_b is not None and B % block_b == 0 and (block_b == B or block_b % 8 == 0):
        tb = block_b
    else:
        tb = B
        if _acc_bytes(tb) > budget * 3 // 5:
            for cand in (2048, 1024, 512, 256, 128):
                if cand < B and B % cand == 0:
                    tb = cand
                    if _acc_bytes(tb) <= budget * 3 // 5:
                        break
            # TODO(synk): masked row-padding path for batch sizes with no
            # multiple-of-128 divisor whose (B,B) accumulators exceed VMEM.
    nb = B // tb

    # ---- D-tile tk: largest multiple of 128 whose double-buffered input
    # blocks + f32 temporaries fit next to the accumulators; D is zero-padded
    # up to kt*tk (zero columns change neither dot products nor norms).
    x_rows = B if add_swap_loss else tb
    rows_per_tile = x_rows + tb + B
    small_scratch = (3 * tb * 128 + 2 * 8 * Bp + 4096) * 4
    reserve = 2 * 1024 * 1024
    avail = budget - _acc_bytes(tb) - small_scratch - reserve
    per_lane = rows_per_tile * (2 * itemsize + 8)
    tk_cap = max(128, (avail // per_lane) // 128 * 128) if avail > 0 else 128
    if block_d is not None:
        tk_cap = max(128, _round_up(block_d, 128))
    d128 = _round_up(D, 128)
    if d128 <= tk_cap:
        tk, kt = d128, 1
    else:
        tk = _round_up(_cdiv(d128, _cdiv(d128, tk_cap)), 128)
        kt = _cdiv(d128, tk)
    d_pad = tk * kt

    if d_pad != D:
        pad = ((0, 0), (0, d_pad - D))
        x = jnp.pad(x, pad)
        p = jnp.pad(p, pad)
        n = jnp.pad(n, pad)

    # ---- specs / scratch ----
    if add_swap_loss:
        x_spec = pl.BlockSpec((B, tk), lambda i, k: (0, k))    # full rows (swap columns)
    else:
        x_spec = pl.BlockSpec((tb, tk), lambda i, k: (i, k))   # row block only
    in_specs = [
        x_spec,
        pl.BlockSpec((tb, tk), lambda i, k: (i, k)),           # pos: row block
        pl.BlockSpec((B, tk), lambda i, k: (0, k)),            # neg: full rows
    ]
    out_specs = pl.BlockSpec((1, 8, 128), lambda i, k: (i, 0, 0))

    scratch = [
        pltpu.VMEM((tb, B), jnp.float32),   # acc_xn     : x . n^T
        pltpu.VMEM((tb, 1), jnp.float32),   # acc_xp     : rowwise x . p
        pltpu.VMEM((tb, 1), jnp.float32),   # acc_xx     : rowwise |x|^2
        pltpu.VMEM((tb, 1), jnp.float32),   # acc_pp     : rowwise |p|^2
        pltpu.VMEM((1, B), jnp.float32),    # acc_nn_row : columnwise |n|^2
    ]
    if add_swap_loss:
        scratch += [
            pltpu.VMEM((tb, B), jnp.float32),   # acc_px     : p . x^T
            pltpu.VMEM((1, B), jnp.float32),    # acc_xx_row : columnwise |x|^2
        ]

    mm = 2 if add_swap_loss else 1
    rows_streamed = nb * B + (nb * B if add_swap_loss else B) + B
    cost = pl.CostEstimate(
        flops=int(2 * mm * B * B * d_pad + 8 * B * d_pad),
        transcendentals=int(2 * mm * B * B),
        bytes_accessed=int(rows_streamed * d_pad * itemsize + nb * 8 * 128 * 4),
    )

    kernel = partial(
        fused_loss_kernel,
        add_swap_loss=add_swap_loss,
        inv_temperature=1.0 / temperature,
        tb=tb,
        batch=B,
    )

    out = pl.pallas_call(
        kernel,
        out_shape=jax.ShapeDtypeStruct((nb, 8, 128), jnp.float32),
        grid_spec=pltpu.PrefetchScalarGridSpec(
            num_scalar_prefetch=0,
            grid=(nb, kt),
            in_specs=in_specs,
            out_specs=out_specs,
            scratch_shapes=scratch,
        ),
        compiler_params=pltpu.CompilerParams(
            dimension_semantics=("parallel", "arbitrary"),
            vmem_limit_bytes=int(budget),
        ),
        cost_estimate=cost,
    )(x, p, n)
    # Per-row-block partial losses (already scaled by 1/B^2); reduce here —
    # never accumulate a scalar across the parallel axis inside the kernel.
    return jnp.sum(out[:, 0, 0])


def _reference(x, p, n, add_swap_loss=False, temperature=TEMPERATURE):
    x = x.astype(jnp.float32)
    p = p.astype(jnp.float32)
    n = n.astype(jnp.float32)

    def cos(a, b):
        na = jnp.maximum(jnp.linalg.norm(a, axis=-1), EPS)
        nb = jnp.maximum(jnp.linalg.norm(b, axis=-1), EPS)
        return jnp.sum(a * b, axis=-1) / (na * nb)

    sim_pos = cos(x, p) / temperature                             # (B,)
    sim_neg = cos(x[:, None, :], n[None, :, :]) / temperature     # (B,B)
    loss = jnp.mean(_softplus_neg(sim_pos[:, None] - sim_neg))
    if add_swap_loss:
        B = x.shape[0]
        sim = cos(p[:, None, :], x[None, :, :]) / temperature
        d = jnp.diag(sim)[:, None] - sim
        d = jnp.where(jnp.eye(B, dtype=bool), 1e9, d)
        loss = loss + jnp.sum(_softplus_neg(d)) / (B * B)
    return loss


if __name__ == "__main__":
    def check(name, got, want, tol):
        got = jax.block_until_ready(got)
        assert bool(jnp.allclose(got, want, rtol=tol, atol=tol)), \
            (name, float(got), float(want))

    k1, k2, k3 = jax.random.split(jax.random.PRNGKey(0), 3)
    batch, hidden = 8, 128
    x = jax.random.normal(k1, (batch, hidden), dtype=jnp.float32)
    pos = jax.random.normal(k2, (batch, hidden), dtype=jnp.float32)
    neg = jax.random.normal(k3, (batch, hidden), dtype=jnp.float32)

    # triplet loss only
    check("triplet",
          triplet_in_batch_neg_sigmoid_contrast_loss(x, pos, neg),
          _reference(x, pos, neg, False), 1e-4)
    # fused triplet + swap loss
    check("triplet+swap",
          triplet_in_batch_neg_sigmoid_contrast_loss(x, pos, neg, add_swap_loss=True),
          _reference(x, pos, neg, True), 1e-4)

    # multi-step D reduction: D=512 tiled as 2 x 256
    k4, k5, k6 = jax.random.split(jax.random.PRNGKey(1), 3)
    x2 = jax.random.normal(k4, (batch, 512), dtype=jnp.float32)
    p2 = jax.random.normal(k5, (batch, 512), dtype=jnp.float32)
    n2 = jax.random.normal(k6, (batch, 512), dtype=jnp.float32)
    check("d-tiled+swap",
          triplet_in_batch_neg_sigmoid_contrast_loss(
              x2, p2, n2, add_swap_loss=True, block_d=256),
          _reference(x2, p2, n2, True), 1e-4)

    # row-block ('parallel') axis + zero-padded D (200 -> 256), with and
    # without the swap term
    k7, k8, k9 = jax.random.split(jax.random.PRNGKey(2), 3)
    B2, D2 = 256, 200
    x3 = jax.random.normal(k7, (B2, D2), dtype=jnp.float32)
    p3 = jax.random.normal(k8, (B2, D2), dtype=jnp.float32)
    n3 = jax.random.normal(k9, (B2, D2), dtype=jnp.float32)
    check("rowblock+swap",
          triplet_in_batch_neg_sigmoid_contrast_loss(
              x3, p3, n3, add_swap_loss=True, block_b=128, block_d=128),
          _reference(x3, p3, n3, True), 1e-3)
    check("rowblock",
          triplet_in_batch_neg_sigmoid_contrast_loss(x3, p3, n3, block_b=128),
          _reference(x3, p3, n3, False), 1e-3)

    print("KERNEL_OK")
</pallas_src>

<mosaic_0001>
module attributes {stable_mosaic.version = 11 : i64} {
  func.func @fused_loss_kernel(%arg0: i32, %arg1: i32, %arg2: memref<8x128xf32, #tpu.memory_space<vmem>>, %arg3: memref<8x128xf32, #tpu.memory_space<vmem>>, %arg4: memref<8x128xf32, #tpu.memory_space<vmem>>, %arg5: memref<1x8x128xf32, #tpu.memory_space<vmem>>, %arg6: memref<8x8xf32, #tpu.memory_space<vmem>>, %arg7: memref<8x1xf32, #tpu.memory_space<vmem>>, %arg8: memref<8x1xf32, #tpu.memory_space<vmem>>, %arg9: memref<8x1xf32, #tpu.memory_space<vmem>>, %arg10: memref<1x8xf32, #tpu.memory_space<vmem>>) attributes {dimension_semantics = [#tpu.dimension_semantics<parallel>, #tpu.dimension_semantics<arbitrary>], iteration_bounds = array<i64: 1, 1>, scalar_prefetch = 0 : i64, scratch_operands = 5 : i64, tpu.core_type = #tpu.core_type<tc>, window_params = [{transform_indices = @transform_0, window_bounds = array<i64: 8, 128>}, {transform_indices = @transform_1, window_bounds = array<i64: 8, 128>}, {transform_indices = @transform_2, window_bounds = array<i64: 8, 128>}, {transform_indices = @transform_3, window_bounds = array<i64: 1, 8, 128>}]} {
    %c0 = arith.constant 0 : index
    %c0_0 = arith.constant 0 : index
    %0 = vector.load %arg2[%c0, %c0_0] : memref<8x128xf32, #tpu.memory_space<vmem>>, vector<8x128xf32>
    %c0_1 = arith.constant 0 : index
    %c0_2 = arith.constant 0 : index
    %1 = vector.load %arg3[%c0_1, %c0_2] : memref<8x128xf32, #tpu.memory_space<vmem>>, vector<8x128xf32>
    %c0_3 = arith.constant 0 : index
    %c0_4 = arith.constant 0 : index
    %2 = vector.load %arg4[%c0_3, %c0_4] : memref<8x128xf32, #tpu.memory_space<vmem>>, vector<8x128xf32>
    %cst = arith.constant dense<0.000000e+00> : vector<8x8xf32>
    %3 = tpu.matmul %0, %2, %cst {dimension_numbers = #tpu.dot_dimension_numbers<[1], [1], [0], [0], [0, 0, 1, 0], [], []>} : vector<8x128xf32>, vector<8x128xf32>, vector<8x8xf32> -> vector<8x8xf32>
    %4 = arith.mulf %0, %1 : vector<8x128xf32>
    %cst_5 = arith.constant dense<0.000000e+00> : vector<8xf32>
    %5 = vector.multi_reduction <add>, %4, %cst_5 [1] : vector<8x128xf32> to vector<8xf32>
    %6 = vector.shape_cast %5 : vector<8xf32> to vector<8x1xf32>
    %7 = arith.mulf %0, %0 : vector<8x128xf32>
    %cst_6 = arith.constant dense<0.000000e+00> : vector<8xf32>
    %8 = vector.multi_reduction <add>, %7, %cst_6 [1] : vector<8x128xf32> to vector<8xf32>
    %9 = vector.shape_cast %8 : vector<8xf32> to vector<8x1xf32>
    %10 = arith.mulf %1, %1 : vector<8x128xf32>
    %cst_7 = arith.constant dense<0.000000e+00> : vector<8xf32>
    %11 = vector.multi_reduction <add>, %10, %cst_7 [1] : vector<8x128xf32> to vector<8xf32>
    %12 = vector.shape_cast %11 : vector<8xf32> to vector<8x1xf32>
    %cst_8 = arith.constant 1.000000e+00 : f32
    %13 = vector.broadcast %cst_8 : f32 to vector<1x128xf32>
    %14 = arith.mulf %2, %2 : vector<8x128xf32>
    %cst_9 = arith.constant dense<0.000000e+00> : vector<1x8xf32>
    %15 = tpu.matmul %13, %14, %cst_9 {dimension_numbers = #tpu.dot_dimension_numbers<[1], [1], [0], [0], [0, 0, 1, 0], [], []>} : vector<1x128xf32>, vector<8x128xf32>, vector<1x8xf32> -> vector<1x8xf32>
    %c0_i32 = arith.constant 0 : i32
    %16 = arith.cmpi eq, %arg1, %c0_i32 : i32
    %17 = arith.extui %16 : i1 to i32
    %c0_i32_10 = arith.constant 0 : i32
    %18 = arith.cmpi ne, %17, %c0_i32_10 : i32
    scf.if %18 {
      %c0_15 = arith.constant 0 : index
      %c0_16 = arith.constant 0 : index
      %25 = vector.load %arg6[%c0_15, %c0_16] : memref<8x8xf32, #tpu.memory_space<vmem>>, vector<8x8xf32>
      tpu.vector_store %arg6[%c0_15, %c0_16], %3 {strides = array<i32>} : memref<8x8xf32, #tpu.memory_space<vmem>>, vector<8x8xf32>,
      %c0_17 = arith.constant 0 : index
      %c0_18 = arith.constant 0 : index
      %26 = vector.load %arg7[%c0_17, %c0_18] : memref<8x1xf32, #tpu.memory_space<vmem>>, vector<8x1xf32>
      tpu.vector_store %arg7[%c0_17, %c0_18], %6 {strides = array<i32>} : memref<8x1xf32, #tpu.memory_space<vmem>>, vector<8x1xf32>,
      %c0_19 = arith.constant 0 : index
      %c0_20 = arith.constant 0 : index
      %27 = vector.load %arg8[%c0_19, %c0_20] : memref<8x1xf32, #tpu.memory_space<vmem>>, vector<8x1xf32>
      tpu.vector_store %arg8[%c0_19, %c0_20], %9 {strides = array<i32>} : memref<8x1xf32, #tpu.memory_space<vmem>>, vector<8x1xf32>,
      %c0_21 = arith.constant 0 : index
      %c0_22 = arith.constant 0 : index
      %28 = vector.load %arg9[%c0_21, %c0_22] : memref<8x1xf32, #tpu.memory_space<vmem>>, vector<8x1xf32>
      tpu.vector_store %arg9[%c0_21, %c0_22], %12 {strides = array<i32>} : memref<8x1xf32, #tpu.memory_space<vmem>>, vector<8x1xf32>,
      %c0_23 = arith.constant 0 : index
      %c0_24 = arith.constant 0 : index
      %29 = vector.load %arg10[%c0_23, %c0_24] : memref<1x8xf32, #tpu.memory_space<vmem>>, vector<1x8xf32>
      tpu.vector_store %arg10[%c0_23, %c0_24], %15 {strides = array<i32>} : memref<1x8xf32, #tpu.memory_space<vmem>>, vector<1x8xf32>,
    } else {
    }
    %c0_i32_11 = arith.constant 0 : i32
    %19 = arith.cmpi sgt, %arg1, %c0_i32_11 : i32
    %20 = arith.extui %19 : i1 to i32
    %c0_i32_12 = arith.constant 0 : i32
    %21 = arith.cmpi ne, %20, %c0_i32_12 : i32
    scf.if %21 {
      %c0_15 = arith.constant 0 : index
      %c0_16 = arith.constant 0 : index
      %25 = vector.load %arg6[%c0_15, %c0_16] : memref<8x8xf32, #tpu.memory_space<vmem>>, vector<8x8xf32>
      %26 = arith.addf %25, %3 : vector<8x8xf32>
      %c0_17 = arith.constant 0 : index
      %c0_18 = arith.constant 0 : index
      %27 = vector.load %arg6[%c0_17, %c0_18] : memref<8x8xf32, #tpu.memory_space<vmem>>, vector<8x8xf32>
      tpu.vector_store %arg6[%c0_17, %c0_18], %26 {strides = array<i32>} : memref<8x8xf32, #tpu.memory_space<vmem>>, vector<8x8xf32>,
      %c0_19 = arith.constant 0 : index
      %c0_20 = arith.constant 0 : index
      %28 = vector.load %arg7[%c0_19, %c0_20] : memref<8x1xf32, #tpu.memory_space<vmem>>, vector<8x1xf32>
      %29 = arith.addf %28, %6 : vector<8x1xf32>
      %c0_21 = arith.constant 0 : index
      %c0_22 = arith.constant 0 : index
      %30 = vector.load %arg7[%c0_21, %c0_22] : memref<8x1xf32, #tpu.memory_space<vmem>>, vector<8x1xf32>
      tpu.vector_store %arg7[%c0_21, %c0_22], %29 {strides = array<i32>} : memref<8x1xf32, #tpu.memory_space<vmem>>, vector<8x1xf32>,
      %c0_23 = arith.constant 0 : index
      %c0_24 = arith.constant 0 : index
      %31 = vector.load %arg8[%c0_23, %c0_24] : memref<8x1xf32, #tpu.memory_space<vmem>>, vector<8x1xf32>
      %32 = arith.addf %31, %9 : vector<8x1xf32>
      %c0_25 = arith.constant 0 : index
      %c0_26 = arith.constant 0 : index
      %33 = vector.load %arg8[%c0_25, %c0_26] : memref<8x1xf32, #tpu.memory_space<vmem>>, vector<8x1xf32>
      tpu.vector_store %arg8[%c0_25, %c0_26], %32 {strides = array<i32>} : memref<8x1xf32, #tpu.memory_space<vmem>>, vector<8x1xf32>,
      %c0_27 = arith.constant 0 : index
      %c0_28 = arith.constant 0 : index
      %34 = vector.load %arg9[%c0_27, %c0_28] : memref<8x1xf32, #tpu.memory_space<vmem>>, vector<8x1xf32>
      %35 = arith.addf %34, %12 : vector<8x1xf32>
      %c0_29 = arith.constant 0 : index
      %c0_30 = arith.constant 0 : index
      %36 = vector.load %arg9[%c0_29, %c0_30] : memref<8x1xf32, #tpu.memory_space<vmem>>, vector<8x1xf32>
      tpu.vector_store %arg9[%c0_29, %c0_30], %35 {strides = array<i32>} : memref<8x1xf32, #tpu.memory_space<vmem>>, vector<8x1xf32>,
      %c0_31 = arith.constant 0 : index
      %c0_32 = arith.constant 0 : index
      %37 = vector.load %arg10[%c0_31, %c0_32] : memref<1x8xf32, #tpu.memory_space<vmem>>, vector<1x8xf32>
      %38 = arith.addf %37, %15 : vector<1x8xf32>
      %c0_33 = arith.constant 0 : index
      %c0_34 = arith.constant 0 : index
      %39 = vector.load %arg10[%c0_33, %c0_34] : memref<1x8xf32, #tpu.memory_space<vmem>>, vector<1x8xf32>
      tpu.vector_store %arg10[%c0_33, %c0_34], %38 {strides = array<i32>} : memref<1x8xf32, #tpu.memory_space<vmem>>, vector<1x8xf32>,
    } else {
    }
    %c0_i32_13 = arith.constant 0 : i32
    %22 = arith.cmpi eq, %arg1, %c0_i32_13 : i32
    %23 = arith.extui %22 : i1 to i32
    %c0_i32_14 = arith.constant 0 : i32
    %24 = arith.cmpi ne, %23, %c0_i32_14 : i32
    scf.if %24 {
      %c0_15 = arith.constant 0 : index
      %c0_16 = arith.constant 0 : index
      %25 = vector.load %arg8[%c0_15, %c0_16] : memref<8x1xf32, #tpu.memory_space<vmem>>, vector<8x1xf32>
      %cst_17 = arith.constant 1.000000e-16 : f32
      %26 = vector.broadcast %cst_17 : f32 to vector<8x1xf32>
      %27 = arith.maximumf %25, %26 : vector<8x1xf32>
      %28 = math.rsqrt %27 : vector<8x1xf32>
      %c0_18 = arith.constant 0 : index
      %c0_19 = arith.constant 0 : index
      %29 = vector.load %arg9[%c0_18, %c0_19] : memref<8x1xf32, #tpu.memory_space<vmem>>, vector<8x1xf32>
      %cst_20 = arith.constant 1.000000e-16 : f32
      %30 = vector.broadcast %cst_20 : f32 to vector<8x1xf32>
      %31 = arith.maximumf %29, %30 : vector<8x1xf32>
      %32 = math.rsqrt %31 : vector<8x1xf32>
      %c0_21 = arith.constant 0 : index
      %c0_22 = arith.constant 0 : index
      %33 = vector.load %arg10[%c0_21, %c0_22] : memref<1x8xf32, #tpu.memory_space<vmem>>, vector<1x8xf32>
      %cst_23 = arith.constant 1.000000e-16 : f32
      %34 = vector.broadcast %cst_23 : f32 to vector<1x8xf32>
      %35 = arith.maximumf %33, %34 : vector<1x8xf32>
      %36 = math.rsqrt %35 : vector<1x8xf32>
      %cst_24 = arith.constant 2.000000e+01 : f32
      %37 = vector.broadcast %cst_24 : f32 to vector<8x1xf32>
      %38 = arith.mulf %28, %37 : vector<8x1xf32>
      %c0_25 = arith.constant 0 : index
      %c0_26 = arith.constant 0 : index
      %39 = vector.load %arg7[%c0_25, %c0_26] : memref<8x1xf32, #tpu.memory_space<vmem>>, vector<8x1xf32>
      %40 = arith.mulf %38, %32 : vector<8x1xf32>
      %41 = arith.mulf %39, %40 : vector<8x1xf32>
      %c0_27 = arith.constant 0 : index
      %c0_28 = arith.constant 0 : index
      %42 = vector.load %arg6[%c0_27, %c0_28] : memref<8x8xf32, #tpu.memory_space<vmem>>, vector<8x8xf32>
      %43 = vector.broadcast %38 : vector<8x1xf32> to vector<8x8xf32>
      %44 = vector.broadcast %36 : vector<1x8xf32> to vector<8x8xf32>
      %45 = arith.mulf %43, %44 : vector<8x8xf32>
      %46 = arith.mulf %42, %45 : vector<8x8xf32>
      %47 = vector.broadcast %41 : vector<8x1xf32> to vector<8x8xf32>
      %48 = arith.subf %47, %46 : vector<8x8xf32>
      %cst_29 = arith.constant 0.000000e+00 : f32
      %49 = vector.broadcast %cst_29 : f32 to vector<8x8xf32>
      %50 = arith.subf %49, %48 : vector<8x8xf32>
      %cst_30 = arith.constant 0.000000e+00 : f32
      %51 = vector.broadcast %cst_30 : f32 to vector<8x8xf32>
      %52 = arith.maximumf %50, %51 : vector<8x8xf32>
      %53 = math.absf %48 : vector<8x8xf32>
      %cst_31 = arith.constant 0.000000e+00 : f32
      %54 = vector.broadcast %cst_31 : f32 to vector<8x8xf32>
      %55 = arith.subf %54, %53 : vector<8x8xf32>
      %56 = math.exp %55 : vector<8x8xf32>
      %57 = math.log1p %56 : vector<8x8xf32>
      %58 = arith.addf %52, %57 : vector<8x8xf32>
      %59 = vector.shape_cast %58 : vector<8x8xf32> to vector<1x8x8xf32>
      %cst_32 = arith.constant dense<0.000000e+00> : vector<1xf32>
      %60 = vector.multi_reduction <add>, %59, %cst_32 [1, 2] : vector<1x8x8xf32> to vector<1xf32>
      %61 = vector.shape_cast %60 : vector<1xf32> to vector<1x1x1xf32>
      %62 = vector.extract %61[0, 0, 0] : f32 from vector<1x1x1xf32>
      %cst_33 = arith.constant 1.562500e-02 : f32
      %63 = arith.mulf %62, %cst_33 : f32
      %64 = vector.broadcast %63 : f32 to vector<1x8x128xf32>
      %c0_34 = arith.constant 0 : index
      %c0_35 = arith.constant 0 : index
      %c0_36 = arith.constant 0 : index
      %65 = vector.load %arg5[%c0_34, %c0_35, %c0_36] : memref<1x8x128xf32, #tpu.memory_space<vmem>>, vector<1x8x128xf32>
      tpu.vector_store %arg5[%c0_34, %c0_35, %c0_36], %64 {strides = array<i32>} : memref<1x8x128xf32, #tpu.memory_space<vmem>>, vector<1x8x128xf32>,
    } else {
    }
    return
  }
  func.func @transform_0(%arg0: i32, %arg1: i32) -> (i32, i32) {
    %c0_i32 = arith.constant 0 : i32
    return %arg0, %arg1 : i32, i32
  }
  func.func @transform_1(%arg0: i32, %arg1: i32) -> (i32, i32) {
    %c0_i32 = arith.constant 0 : i32
    return %arg0, %arg1 : i32, i32
  }
  func.func @transform_2(%arg0: i32, %arg1: i32) -> (i32, i32) {
    %c0_i32 = arith.constant 0 : i32
    %c0_i32_0 = arith.constant 0 : i32
    return %c0_i32, %arg1 : i32, i32
  }
  func.func @transform_3(%arg0: i32, %arg1: i32) -> (i32, i32, i32) {
    %c0_i32 = arith.constant 0 : i32
    %c0_i32_0 = arith.constant 0 : i32
    %c0_i32_1 = arith.constant 0 : i32
    return %arg0, %c0_i32, %c0_i32_0 : i32, i32, i32
  }
}

</mosaic_0001>

<bundles_post_ra>
// kernel: tpu_custom_call.1
= control target key start
LH: loop header
LB: loop body
LE: loop exit
PB: predicated region body
PF: predicated region fallthrough
CT: control target
= control target key end

     0   :  { %8 = vsyncpa [#allocation8], 0  ;;  %s414_s0 = inlined_call_operand.hbm [shape: f32[8,128], index: 0, kind: input, shape index: {}]   ;;  %s415_s1 = inlined_call_operand.hbm [shape: f32[8,128], index: 1, kind: input, shape index: {}]   ;;  %s416_s2 = inlined_call_operand.hbm [shape: f32[8,128], index: 2, kind: input, shape index: {}]   ;;  %s417_s3 = inlined_call_operand.hbm [shape: f32[1,8,128], index: 3, kind: output, shape index: {}]  }
   0x1   :  { %9 = vsyncpa [#allocation11], 0  ;;  %s27_s14 = sshll.u32 %s415_s1, 4  ;;  %s28_s14 = int_to_ptr.hbm [resolvable:$true] %s27_s14 }
   0x2   :  { %10 = vsyncpa [#allocation9], 0  ;;  %s374_s15 = smov [#allocation10]   ;;  %s16_s19 = sshll.u32 %s414_s0, 4  ;;  %s17_s19 = int_to_ptr.hbm [resolvable:$true] %s16_s19 }
   0x3   :  { %s29_s16 = sshll.u32 %s374_s15, 4  ;;  %s375_s20 = smov [#allocation7]   ;;  %s30_s16 = int_to_ptr.vmem [resolvable:$true] %s29_s16 }
   0x4   :  { %32 = dma.hbm_to_vmem [thread:$0]  %s28_s14, 128, %s30_s16, [#allocation11]  }
   0x5   :  { %s18_s21 = sshll.u32 %s375_s20, 4  ;;  %s38_s24 = sshll.u32 %s416_s2, 4  ;;  %s19_s21 = int_to_ptr.vmem [resolvable:$true] %s18_s21  ;;  %s39_s24 = int_to_ptr.hbm [resolvable:$true] %s38_s24 }
   0x6   :  { %21 = dma.hbm_to_vmem [thread:$0]  %s17_s19, 128, %s19_s21, [#allocation8]  }
   0x7   :  { %s376_s1 = smov [#allocation12]  }
   0x8   :  { %s40_s25 = sshll.u32 %s376_s1, 4  ;;  %s41_s25 = int_to_ptr.vmem [resolvable:$true] %s40_s25 }
   0x9   :  { %43 = dma.hbm_to_vmem [thread:$0]  %s39_s24, 128, %s41_s25, [#allocation11]  }
   0xa   :  { %368 = dma.done.wait [#allocation8], 128  }
   0xb   :  { %369 = vsyncadd [#allocation8], 4294967168 }
   0xc   :  { %370 = dma.done.wait [#allocation11], 256  }
   0xd   :  { %371 = vsyncadd [#allocation11], 4294967040  ;;  %v56_v0 = vld [vmem:[#allocation7] sm:$0xff]  ;;  %v57_v1 = vld [vmem:[#allocation10] sm:$0xff]  ;;  %v377_v7 = vmov 1.0   ;;  %v378_v8 = vmov 0  }
   0xe   :  { %v58_v2 = vld [vmem:[#allocation12] sm:$0xff]  ;;  %v82_v3 = vmul.f32 %v56_v0, %v56_v0  ;;  %v79_v4 = vmul.f32 %v57_v1, %v56_v0  ;;  %v85_v6 = vmul.f32 %v57_v1, %v57_v1  ;;  %259 = vset.pattern.permute.xlu1 %v378_v8  ;;  %260 = vset.pattern.permute.xlu2 %v378_v8  ;;  %vm115_vm0 = vcmask 7168   ;;  %s379_s0 = smov [#allocation13]   ;;  %s240_s28 = sshll.u32 %s417_s3, 4  ;;  %s241_s28 = int_to_ptr.hbm [resolvable:$true] %s240_s28 }
   0xf   :  { %v88_v5 = vmul.f32 %v58_v2, %v58_v2  ;;  %74 = vmatpush.xpose.msra.mxu0 %v58_v2  ;;  %261 = vset.pattern.permute.xlu0 %v378_v8  ;;  %vm119_vm1 = vcmask 57344   ;;  %vm113_vm8 = vcmask 64512   ;;  %s238_s2 = sshll.u32 %s379_s0, 4  ;;  %s239_s2 = int_to_ptr.vmem [resolvable:$true] %s238_s2 }
  0x10   :  { %83 = vadd.xlane.f32.xlu0 %v82_v3  ;;  %80 = vadd.xlane.f32.xlu1 %v79_v4 }
  0x11   :  { %104 = vmatpush.xpose.msra.mxu1 %v88_v5 }
  0x12   :  { %75 = vmatmul.f32.vlgmr.msra.gmra.mxu0 %v56_v0 }
  0x14   :  { %105 = vmatmul.f32.vlgmr.msra.gmra.mxu1 %v377_v7 }
  0x18   :  { %86 = vadd.xlane.f32.xlu0 %v85_v6 }
  0x83   :  { %v84_v9 = vpop.xlane.xlu0 %83  ;;  %v81_v10 = vpop.xlane.xlu1 %80 }
  0x84   :  { %117 = vst.msk [vmem:[#allocation4] sm:$0xff] %vm115_vm0, %v84_v9 }
  0x85   :  { %116 = vst.msk [vmem:[#allocation3] sm:$0xff] %vm115_vm0, %v81_v10 }
  0x8b   :  { %v87_v11 = vpop.xlane.xlu0 %86  ;;  %v146_v12 = vld [vmem:[#allocation4] sm:$0xff] }
  0x8c   :  { %118 = vst.msk [vmem:[#allocation5] sm:$0xff] %vm115_vm0, %v87_v11  ;;  %v147_v13 = vmax.f32 %v146_v12, 1e-16  ;;  %v183_v32 = vld [vmem:[#allocation3] sm:$0xff] }
  0x8e   :  { %262 = vrsqrt.f32 %v147_v13  ;;  %vm154_vm3 = vweird.f32 %v147_v13 }
  0x8f   :  { %v76_v35 = vpop.f32.mrf.mxu0 }
  0x90   :  { %114 = vst.msk [vmem:[#allocation2] sm:$0xff] %vm113_vm8, %v76_v35 }
  0x91   :  { %v106_v14 = vpop.f32.mrf.mxu1 }
  0x92   :  { %120 = vst.msk [vmem:[#allocation6] sm:$0x1] %vm119_vm1, %v106_v14 }
  0x93   :  { %v158_v15 = vld [vmem:[#allocation5] sm:$0xff] }
  0x94   :  { %v263_v16 = vpop.eup %262  ;;  %v159_v17 = vmax.f32 %v158_v15, 1e-16 }
  0x95   :  { %v149_v18 = vmul.f32 %v263_v16, %v147_v13  ;;  %vm155_vm2 = vweird.f32 %v263_v16 }
  0x96   :  { %264 = vrsqrt.f32 %v159_v17  ;;  %vm156_vm4 = vmor %vm154_vm3, %vm155_vm2  ;;  %vm166_vm5 = vweird.f32 %v159_v17 }
  0x97   :  { %v150_v19 = vmul.f32 %v263_v16, %v149_v18  ;;  %v186_v47 = vld [vmem:[#allocation2] sm:$0xff] }
  0x99   :  { %v151_v20 = vmul.f32 0.5, %v150_v19  ;;  %v170_v36 = vld [vmem:[#allocation6] sm:$0x1] }
  0x9a   :  { %v171_v37 = vmax.f32 %v170_v36, 1e-16 }
  0x9b   :  { %v152_v21 = vsub.f32 1.5, %v151_v20 }
  0x9c   :  { %v265_v22 = vpop.eup %264  ;;  %266 = vrsqrt.f32 %v171_v37  ;;  %vm178_vm9 = vweird.f32 %v171_v37 }
  0x9d   :  { %v153_v23 = vmul.f32 %v263_v16, %v152_v21  ;;  %v161_v24 = vmul.f32 %v265_v22, %v159_v17  ;;  %vm167_vm6 = vweird.f32 %v265_v22 }
  0x9e   :  { %vm168_vm7 = vmor %vm166_vm5, %vm167_vm6 }
  0x9f   :  { %v157_v25 = vsel %vm156_vm4, %v263_v16, %v153_v23  ;;  %v162_v26 = vmul.f32 %v265_v22, %v161_v24 }
  0xa0   :  { %v182_v27 = vmul.f32 20.0, %v157_v25 }
  0xa1   :  { %v163_v28 = vmul.f32 0.5, %v162_v26 }
  0xa2   :  { %189 = vperm.xlu1 %259, %v182_v27   ;;  %v267_v38 = vpop.eup %266 }
  0xa3   :  { %v164_v29 = vsub.f32 1.5, %v163_v28  ;;  %v173_v39 = vmul.f32 %v267_v38, %v171_v37  ;;  %vm179_vm10 = vweird.f32 %v267_v38 }
  0xa4   :  { %vm180_vm11 = vmor %vm178_vm9, %vm179_vm10 }
  0xa5   :  { %v165_v30 = vmul.f32 %v265_v22, %v164_v29  ;;  %v174_v40 = vmul.f32 %v267_v38, %v173_v39 }
  0xa7   :  { %v169_v31 = vsel %vm168_vm7, %v265_v22, %v165_v30  ;;  %v175_v41 = vmul.f32 0.5, %v174_v40 }
  0xa8   :  { %v184_v33 = vmul.f32 %v182_v27, %v169_v31 }
  0xa9   :  { %v176_v42 = vsub.f32 1.5, %v175_v41 }
  0xaa   :  { %v185_v34 = vmul.f32 %v184_v33, %v183_v32 }
  0xab   :  { %v177_v43 = vmul.f32 %v267_v38, %v176_v42 }
  0xac   :  { %199 = vperm.xlu2 %260, %v185_v34  }
  0xad   :  { %v181_v44 = vsel %vm180_vm11, %v267_v38, %v177_v43 }
  0xae   :  { %v193_v45 = vperm.slane %v181_v44, 0 }
 0x106   :  { %v200_v50 = vpop.permute.xlu2 %199 }
 0x114   :  { %v190_v46 = vpop.permute.xlu1 %189 }
 0x115   :  { %v195_v48 = vmul.f32 %v193_v45, %v190_v46 }
 0x117   :  { %v196_v49 = vmul.f32 %v195_v48, %v186_v47 }
 0x119   :  { %v202_v51 = vsub.f32 %v200_v50, %v196_v49 }
 0x11b   :  { %v205_v52 = vand.u32 2147483647, %v202_v51  ;;  %v203_v59 = vsub.f32 0.0, %v202_v51 }
 0x11d   :  { %v206_v53 = vsub.f32 0.0, %v205_v52  ;;  %v204_v0 = vmax.f32 %v203_v59, 0.0 }
 0x11f   :  { %v207_v54 = vmul.f32 1.442695, %v206_v53 }
 0x121   :  { %268 = vpow2.f32 %v207_v54 }
 0x127   :  { %v269_v55 = vpop.eup %268 }
 0x128   :  { %v209_v56 = vadd.f32 1.0, %v269_v55  ;;  %v212_v57 = vmul.f32 -0.5, %v269_v55  ;;  %v215_v60 = vand.u32 2147483647, %v269_v55 }
 0x12a   :  { %270 = vlog2.f32 %v209_v56  ;;  %v213_v58 = vadd.f32 1.0, %v212_v57  ;;  %vm216_vm12 = vcmp.lt.f32.partialorder %v215_v60, 0.0004427343 }
 0x12c   :  { %v214_v63 = vmul.f32 %v269_v55, %v213_v58 }
 0x130   :  { %v271_v61 = vpop.eup %270 }
 0x131   :  { %v211_v62 = vmul.f32 0.6931472, %v271_v61 }
 0x133   :  { %v217_v1 = vsel %vm216_vm12, %v214_v63, %v211_v62 }
 0x134   :  { %v218_v2 = vadd.f32 %v217_v1, %v204_v0 }
 0x136   :  { %v220_v3 = vsel %vm113_vm8, %v218_v2, 0.0 }
 0x137   :  { %221 = vadd.xlane.f32.xlu2 %v220_v3 }
 0x1aa   :  { %v222_v4 = vpop.xlane.xlu2 %221 }
 0x1ab   :  { %v223_v5 = vrot.slane %v222_v4, 4 }
 0x1ad   :  { %v224_v6 = vadd.f32 %v223_v5, %v222_v4 }
 0x1af   :  { %v225_v7 = vrot.slane %v224_v6, 2 }
 0x1b1   :  { %v226_v8 = vadd.f32 %v225_v7, %v224_v6 }
 0x1b3   :  { %v227_v9 = vrot.slane %v226_v8, 1 }
 0x1b5   :  { %v228_v10 = vadd.f32 %v227_v9, %v226_v8 }
 0x1b7   :  { %251 = vpush %v228_v10 }
 0x1e8   :  { %s252_s29 = spop %251 }
 0x1e9   :  { %s230_s30 = smul.f32 0.015625, %s252_s29 }
 0x1eb   :  { %v231_v11 = vstv %s230_s30 }
 0x1ec   :  { %232 = vst [vmem:[#allocation13] sm:$0xff] %v231_v11 }
 0x1ed   :  { %243 = dma.vmem_to_hbm [thread:$0]  %s239_s2, 128, %s241_s28, [#allocation9]  }
 0x1ee   :  { %372 = dma.done.wait [#allocation9], 128  }
 0x1ef   :  { %373 = vsyncadd [#allocation9], 4294967168 }
 0x1f0   :  { %248 = vsyncpa [#allocation8], 1 }
 0x1f1   :  { %249 = vsyncpa [#allocation11], 1 }
 0x1f2   :  { %250 = vsyncpa [#allocation9], 1 }

</bundles_post_ra>
